<compile_context>
chip_gen: v5e
topology: v5e:2x2
jax: 0.10.0
libtpu: 0.0.40
codegen_flags: <defaults>
</compile_context>

<pallas_src>
import functools

import jax
import jax.numpy as jnp
import numpy as np
from jax.experimental import pallas as pl
from jax.experimental.pallas import tpu as pltpu


# ----------------------------------------------------------------------------
# The single fused kernel (grid = (batch,), one sample per step)
# ----------------------------------------------------------------------------
def _fused_dueling_kernel(*refs, layer_meta, mean_denom):
    # refs = (x, [Wband, b_row] * n_layers, W_head, b_head, adv_mask, q_mask,
    #         out, act_scratch_0, ..., act_scratch_{n_layers-2})
    n_layers = len(layer_meta)
    x_ref = refs[0]
    head_off = 1 + 2 * n_layers
    wh_ref, bh_ref, advm_ref, qm_ref, o_ref = refs[head_off:head_off + 5]
    act_scratch = refs[head_off + 5:]

    i = pl.program_id(0)
    srcs = (x_ref,) + tuple(act_scratch)      # input slab of each ReLU layer (VMEM refs)

    h = None
    for li, (kh, stride_h, out_h) in enumerate(layer_meta):   # conv1, conv2, fc1
        w_ref = refs[1 + 2 * li]              # (KH, 128, 128) banded weight, bf16
        b_ref = refs[2 + 2 * li]              # (1, 128) bias row, f32
        src = srcs[li]
        acc = None
        for ki in range(kh):                  # unrolled kernel-row sweep
            # Strided sublane slice replaces the old S @ h gather matmul.
            sl = pl.ds(ki, out_h, stride=stride_h) if stride_h > 1 else pl.ds(ki, out_h)
            rows = src[sl, :].astype(jnp.bfloat16)
            part = jnp.dot(rows, w_ref[ki], preferred_element_type=jnp.float32)
            acc = part if acc is None else acc + part
        h = jnp.maximum(acc + b_ref[...], 0.0)               # f32 bias + ReLU (VPU)
        if li + 1 < n_layers:
            act_scratch[li][0:out_h, :] = h                  # stage for next layer

    # fc2 for both heads, lane-dense:
    #   lanes [0, A)  = A + V (both biases), lanes [A, 2A) = A alone (feeds the mean)
    qv = jnp.dot(h.astype(jnp.bfloat16), wh_ref[...],
                 preferred_element_type=jnp.float32) + bh_ref[...]   # (1, 128) f32
    o_ref[pl.ds(i, 1), :] = qv                # resident (B,128) output, one row per step

    # Dueling combine at the last grid step: Q = (A + V) - mean(A) over ALL A elems.
    @pl.when(i == pl.num_programs(0) - 1)
    def _():
        qv_all = o_ref[...]                                   # (B, 128), all samples
        mean_adv = jnp.sum(qv_all * advm_ref[...]) * (1.0 / mean_denom)
        o_ref[...] = (qv_all - mean_adv) * qm_ref[...]        # zero lanes >= A


def _forward(x_nchw, operands, *, n_actions, pad_lanes, layer_meta, scratch_rows):
    B, C, H, W = x_nchw.shape
    # NCHW -> NHWC -> (B, H, W*C), zero-padded to pad_lanes lanes (layout plumbing only).
    x3d = jnp.transpose(x_nchw, (0, 2, 3, 1)).reshape(B, H, W * C)
    x3d = jnp.pad(x3d, ((0, 0), (0, 0), (0, pad_lanes - W * C)))

    kernel = functools.partial(
        _fused_dueling_kernel,
        layer_meta=layer_meta,
        mean_denom=float(B * n_actions),
    )

    def _const_map(nd):
        return lambda i, _nd=nd: (0,) * _nd

    # Per-sample input block; all weights/biases/masks are full blocks with constant
    # index_maps so they stay resident in VMEM across the batch grid.
    in_specs = [pl.BlockSpec((None, H, pad_lanes), lambda i: (i, 0, 0))]
    in_specs += [pl.BlockSpec(op.shape, _const_map(op.ndim)) for op in operands]

    q_pad = pl.pallas_call(
        kernel,
        grid=(B,),
        out_shape=jax.ShapeDtypeStruct((B, pad_lanes), jnp.float32),
        in_specs=in_specs,
        # Output resident across the whole grid (finalized at the last step).
        out_specs=pl.BlockSpec((B, pad_lanes), lambda i: (0, 0)),
        scratch_shapes=[pltpu.VMEM((r, pad_lanes), jnp.float32) for r in scratch_rows],
        compiler_params=pltpu.CompilerParams(
            # Whole-batch advantage mean couples samples -> sequential batch axis.
            # TODO(synk): v7x 2-TC split needs a cross-core partial-sum reduction.
            dimension_semantics=("arbitrary",),
            # Explicit budget (actual footprint ~0.4 MiB) — safe on v5e/v6e/v7x.
            vmem_limit_bytes=32 * 1024 * 1024,
        ),
    )(x3d, *operands)
    return q_pad[:, :n_actions]


dueling_dqn_forward = jax.jit(
    _forward,
    static_argnames=("n_actions", "pad_lanes", "layer_meta", "scratch_rows"))


# ----------------------------------------------------------------------------
# Host-side weight packing: conv -> banded (lane-padded) weight per kernel row
# ----------------------------------------------------------------------------
def _banded_conv_weight(w_conv, in_w, out_w, stride_w, in_lanes, out_lanes):
    """(KH, KW, C_in, C_out) -> (KH, in_lanes, out_lanes).  Acting on a row-major
    (h, w*c) slab (zero-padded to `in_lanes` lanes), it performs the kernel-column
    sweep + channel contraction for one kernel row; zeros outside the stride band
    and in the lane padding."""
    kh, kw, ci, co = w_conv.shape
    assert in_w * ci <= in_lanes and out_w * co <= out_lanes
    big = np.zeros((kh, in_lanes, out_lanes), np.float32)
    for ki in range(kh):
        for ow in range(out_w):
            for kj in range(kw):
                iw = ow * stride_w + kj
                big[ki, iw * ci:(iw + 1) * ci, ow * co:(ow + 1) * co] = w_conv[ki, kj]
    return big


def build_fused_operands(adv_params, val_params, *, in_hw, in_ch, output_size,
                         pad_lanes=128):
    assert 2 * output_size <= pad_lanes
    operands = []
    layer_meta = []
    h_cur, w_cur = in_hw
    c_cat = in_ch
    adv_off, adv_cnt = 0, in_ch        # layer 1: both heads read the same input channels
    val_off, val_cnt = 0, in_ch

    for (Wa, ba, st), (Wv, bv, _) in zip(adv_params["convs"], val_params["convs"]):
        Wa = np.asarray(Wa, np.float32)
        Wv = np.asarray(Wv, np.float32)
        ba = np.asarray(ba, np.float32)
        bv = np.asarray(bv, np.float32)
        kh, kw, _, co_a = Wa.shape
        co_v = Wv.shape[3]
        # conv1: concat along C_out (shared input); deeper convs: block-diagonal.
        w_cat = np.zeros((kh, kw, c_cat, co_a + co_v), np.float32)
        w_cat[:, :, adv_off:adv_off + adv_cnt, :co_a] = Wa
        w_cat[:, :, val_off:val_off + val_cnt, co_a:] = Wv
        b_cat = np.concatenate([ba, bv])
        out_h = (h_cur - kh) // st[0] + 1
        out_w = (w_cur - kw) // st[1] + 1
        band = _banded_conv_weight(w_cat, w_cur, out_w, st[1], pad_lanes, pad_lanes)
        b_row = np.zeros((1, pad_lanes), np.float32)
        b_row[0, :out_w * (co_a + co_v)] = np.tile(b_cat, out_w)
        operands += [jnp.asarray(band, dtype=jnp.bfloat16), jnp.asarray(b_row)]
        layer_meta.append((kh, st[0], out_h))
        h_cur, w_cur, c_cat = out_h, out_w, co_a + co_v
        adv_off, adv_cnt = 0, co_a
        val_off, val_cnt = co_a, co_v

    # fc1 (both heads) as one more "conv" whose kernel covers the whole remaining
    # spatial extent -> 1x1 output with 2*hidden channels (NHWC flatten order).
    W1a, b1a = adv_params["fc1"]
    W1v, b1v = val_params["fc1"]
    W1a = np.asarray(W1a, np.float32)
    W1v = np.asarray(W1v, np.float32)
    hid_a, hid_v = W1a.shape[1], W1v.shape[1]
    assert hid_a + hid_v <= pad_lanes
    w_fc = np.zeros((h_cur, w_cur, c_cat, hid_a + hid_v), np.float32)
    w_fc[:, :, adv_off:adv_off + adv_cnt, :hid_a] = W1a.reshape(h_cur, w_cur, adv_cnt, hid_a)
    w_fc[:, :, val_off:val_off + val_cnt, hid_a:] = W1v.reshape(h_cur, w_cur, val_cnt, hid_v)
    band = _banded_conv_weight(w_fc, w_cur, 1, 1, pad_lanes, pad_lanes)
    b_row = np.zeros((1, pad_lanes), np.float32)
    b_row[0, :hid_a + hid_v] = np.concatenate(
        [np.asarray(b1a, np.float32), np.asarray(b1v, np.float32)])
    operands += [jnp.asarray(band, dtype=jnp.bfloat16), jnp.asarray(b_row)]
    layer_meta.append((h_cur, 1, 1))

    # fc2 (both heads; value head also emits `output_size` values — PyTorch quirk),
    # packed into one lane-dense (128, 128) weight for the kernel epilogue.
    W2a, b2a = adv_params["fc2"]
    W2v, b2v = val_params["fc2"]
    W2a = np.asarray(W2a, np.float32)
    W2v = np.asarray(W2v, np.float32)
    nA = output_size
    w_head = np.zeros((pad_lanes, pad_lanes), np.float32)
    w_head[:hid_a, :nA] = W2a                 # lanes [0,A): A + V
    w_head[hid_a:hid_a + hid_v, :nA] = W2v
    w_head[:hid_a, nA:2 * nA] = W2a           # lanes [A,2A): A alone (for the mean)
    b_head = np.zeros((1, pad_lanes), np.float32)
    b_head[0, :nA] = np.asarray(b2a, np.float32) + np.asarray(b2v, np.float32)
    b_head[0, nA:2 * nA] = np.asarray(b2a, np.float32)
    adv_mask = np.zeros((1, pad_lanes), np.float32)
    adv_mask[0, nA:2 * nA] = 1.0
    q_mask = np.zeros((1, pad_lanes), np.float32)
    q_mask[0, :nA] = 1.0
    operands += [jnp.asarray(w_head, dtype=jnp.bfloat16), jnp.asarray(b_head),
                 jnp.asarray(adv_mask), jnp.asarray(q_mask)]

    # One VMEM activation scratch per non-final layer (rows rounded up to a sublane tile).
    scratch_rows = tuple(((oh + 7) // 8) * 8 for (_, _, oh) in layer_meta[:-1])
    meta = dict(layer_meta=tuple(layer_meta), n_actions=nA, pad_lanes=pad_lanes,
                scratch_rows=scratch_rows)
    return tuple(operands), meta


# ----------------------------------------------------------------------------
# Parameter construction (deterministic, in-script)
# ----------------------------------------------------------------------------
def init_cnn_params(key, in_ch, hw, conv_params, hidden_dim, output_size):
    h, w = hw
    c = in_ch
    keys = jax.random.split(key, 2 * len(conv_params) + 4)
    ki = 0
    convs = []
    for (ic, oc, ksz, st) in conv_params:
        assert ic == c, "conv_params channel chain mismatch"
        kh, kw = ksz
        fan_in = ic * kh * kw
        W = jax.random.normal(keys[ki], (kh, kw, ic, oc), jnp.float32) / jnp.sqrt(fan_in)
        ki += 1
        bb = 0.01 * jax.random.normal(keys[ki], (oc,), jnp.float32)
        ki += 1
        convs.append((W, bb, st))
        h = (h - kh) // st[0] + 1
        w = (w - kw) // st[1] + 1
        c = oc
    flat = h * w * c
    W1 = jax.random.normal(keys[ki], (flat, hidden_dim), jnp.float32) / jnp.sqrt(flat)
    ki += 1
    b1 = 0.01 * jax.random.normal(keys[ki], (hidden_dim,), jnp.float32)
    ki += 1
    W2 = jax.random.normal(keys[ki], (hidden_dim, output_size), jnp.float32) / jnp.sqrt(hidden_dim)
    ki += 1
    b2 = 0.01 * jax.random.normal(keys[ki], (output_size,), jnp.float32)
    return {"convs": convs, "fc1": (W1, b1), "fc2": (W2, b2)}


# ----------------------------------------------------------------------------
# Pure numpy (float64) reference of one head, for a correctness check
# ----------------------------------------------------------------------------
def _np_head_forward(x_nhwc, params):
    h = x_nhwc.astype(np.float64)
    for (Wc, bc, st) in params["convs"]:
        Wc = np.asarray(Wc, np.float64)
        bc = np.asarray(bc, np.float64)
        KH, KW, _, CO = Wc.shape
        Bn, Hh, Ww, _ = h.shape
        OH = (Hh - KH) // st[0] + 1
        OW = (Ww - KW) // st[1] + 1
        out = np.zeros((Bn, OH, OW, CO), np.float64)
        for ki in range(KH):
            for kj in range(KW):
                patch = h[:, ki:ki + st[0] * OH:st[0], kj:kj + st[1] * OW:st[1], :]
                out += np.einsum("bhwc,co->bhwo", patch, Wc[ki, kj])
        h = np.maximum(out + bc, 0.0)
    flat = h.reshape(h.shape[0], -1)
    W1, b1 = params["fc1"]
    W2, b2 = params["fc2"]
    hfc = np.maximum(flat @ np.asarray(W1, np.float64) + np.asarray(b1, np.float64), 0.0)
    return hfc @ np.asarray(W2, np.float64) + np.asarray(b2, np.float64)


# ----------------------------------------------------------------------------
if __name__ == "__main__":
    key = jax.random.PRNGKey(0)
    k_in, k_adv, k_val = jax.random.split(key, 3)

    B, C, H, W = 2, 4, 16, 16
    conv_params = [(4, 8, (3, 3), (2, 2)), (8, 16, (3, 3), (2, 2))]
    hidden_dim = 32
    output_size = 6

    x = jax.random.normal(k_in, (B, C, H, W), jnp.float32)          # NCHW, like PyTorch
    adv_params = init_cnn_params(k_adv, C, (H, W), conv_params, hidden_dim, output_size)
    val_params = init_cnn_params(k_val, C, (H, W), conv_params, hidden_dim, output_size)

    operands, meta = build_fused_operands(
        adv_params, val_params, in_hw=(H, W), in_ch=C, output_size=output_size)

    q = dueling_dqn_forward(
        x, operands,
        n_actions=meta["n_actions"], pad_lanes=meta["pad_lanes"],
        layer_meta=meta["layer_meta"], scratch_rows=meta["scratch_rows"])
    q = jax.block_until_ready(q)
    assert q.shape == (B, output_size), q.shape
    assert q.dtype == jnp.float32

    # Reference check (numpy float64, f32 params): Q = V + (A - A.mean()), scalar mean
    # over all A.  Tolerance loosened vs. the all-f32 kernel because MXU operands are
    # now bfloat16 (f32 accumulation).
    x_nhwc = np.asarray(x).transpose(0, 2, 3, 1)
    a_ref = _np_head_forward(x_nhwc, adv_params)
    v_ref = _np_head_forward(x_nhwc, val_params)
    q_ref = v_ref + (a_ref - a_ref.mean())
    np.testing.assert_allclose(np.asarray(q), q_ref, rtol=5e-2, atol=5e-2)

    print("KERNEL_OK")
</pallas_src>

<mosaic_0001>
module attributes {stable_mosaic.version = 11 : i64} {
  func.func @_fused_dueling_kernel(%arg0: i32, %arg1: memref<1x16x128xf32, #tpu.memory_space<vmem>>, %arg2: memref<3x128x128xbf16, #tpu.memory_space<vmem>>, %arg3: memref<1x128xf32, #tpu.memory_space<vmem>>, %arg4: memref<3x128x128xbf16, #tpu.memory_space<vmem>>, %arg5: memref<1x128xf32, #tpu.memory_space<vmem>>, %arg6: memref<3x128x128xbf16, #tpu.memory_space<vmem>>, %arg7: memref<1x128xf32, #tpu.memory_space<vmem>>, %arg8: memref<128x128xbf16, #tpu.memory_space<vmem>>, %arg9: memref<1x128xf32, #tpu.memory_space<vmem>>, %arg10: memref<1x128xf32, #tpu.memory_space<vmem>>, %arg11: memref<1x128xf32, #tpu.memory_space<vmem>>, %arg12: memref<2x128xf32, #tpu.memory_space<vmem>>, %arg13: memref<8x128xf32, #tpu.memory_space<vmem>>, %arg14: memref<8x128xf32, #tpu.memory_space<vmem>>) attributes {dimension_semantics = [#tpu.dimension_semantics<arbitrary>], iteration_bounds = array<i64: 2>, scalar_prefetch = 0 : i64, scratch_operands = 2 : i64, tpu.core_type = #tpu.core_type<tc>, window_params = [{transform_indices = @transform_0, window_bounds = array<i64: 1, 16, 128>}, {pipeline_mode = #tpu.pipeline_mode<synchronous>, transform_indices = @transform_1, window_bounds = array<i64: 3, 128, 128>}, {pipeline_mode = #tpu.pipeline_mode<synchronous>, transform_indices = @transform_2, window_bounds = array<i64: 1, 128>}, {pipeline_mode = #tpu.pipeline_mode<synchronous>, transform_indices = @transform_3, window_bounds = array<i64: 3, 128, 128>}, {pipeline_mode = #tpu.pipeline_mode<synchronous>, transform_indices = @transform_4, window_bounds = array<i64: 1, 128>}, {pipeline_mode = #tpu.pipeline_mode<synchronous>, transform_indices = @transform_5, window_bounds = array<i64: 3, 128, 128>}, {pipeline_mode = #tpu.pipeline_mode<synchronous>, transform_indices = @transform_6, window_bounds = array<i64: 1, 128>}, {pipeline_mode = #tpu.pipeline_mode<synchronous>, transform_indices = @transform_7, window_bounds = array<i64: 128, 128>}, {pipeline_mode = #tpu.pipeline_mode<synchronous>, transform_indices = @transform_8, window_bounds = array<i64: 1, 128>}, {pipeline_mode = #tpu.pipeline_mode<synchronous>, transform_indices = @transform_9, window_bounds = array<i64: 1, 128>}, {pipeline_mode = #tpu.pipeline_mode<synchronous>, transform_indices = @transform_10, window_bounds = array<i64: 1, 128>}, {pipeline_mode = #tpu.pipeline_mode<synchronous>, transform_indices = @transform_11, window_bounds = array<i64: 2, 128>}]} {
    %c0 = arith.constant 0 : index
    %c0_0 = arith.constant 0 : index
    %c0_1 = arith.constant 0 : index
    %0 = tpu.strided_load %arg1[%c0, %c0_0, %c0_1] {strides = array<i32: 1, 2, 1>} : memref<1x16x128xf32, #tpu.memory_space<vmem>>, vector<1x7x128xf32>
    %1 = vector.shape_cast %0 : vector<1x7x128xf32> to vector<7x128xf32>
    %2 = arith.truncf %1 : vector<7x128xf32> to vector<7x128xbf16>
    %c0_2 = arith.constant 0 : index
    %c0_3 = arith.constant 0 : index
    %c0_4 = arith.constant 0 : index
    %3 = vector.load %arg2[%c0_2, %c0_3, %c0_4] : memref<3x128x128xbf16, #tpu.memory_space<vmem>>, vector<1x128x128xbf16>
    %4 = vector.shape_cast %3 : vector<1x128x128xbf16> to vector<128x128xbf16>
    %cst = arith.constant dense<0.000000e+00> : vector<7x128xf32>
    %5 = tpu.matmul %2, %4, %cst {dimension_numbers = #tpu.dot_dimension_numbers<[1], [0], [0], [1], [0, 0, 1, 1], [], []>} : vector<7x128xbf16>, vector<128x128xbf16>, vector<7x128xf32> -> vector<7x128xf32>
    %c0_5 = arith.constant 0 : index
    %c1 = arith.constant 1 : index
    %c0_6 = arith.constant 0 : index
    %6 = tpu.strided_load %arg1[%c0_5, %c1, %c0_6] {strides = array<i32: 1, 2, 1>} : memref<1x16x128xf32, #tpu.memory_space<vmem>>, vector<1x7x128xf32>
    %7 = vector.shape_cast %6 : vector<1x7x128xf32> to vector<7x128xf32>
    %8 = arith.truncf %7 : vector<7x128xf32> to vector<7x128xbf16>
    %c1_7 = arith.constant 1 : index
    %c0_8 = arith.constant 0 : index
    %c0_9 = arith.constant 0 : index
    %9 = vector.load %arg2[%c1_7, %c0_8, %c0_9] : memref<3x128x128xbf16, #tpu.memory_space<vmem>>, vector<1x128x128xbf16>
    %10 = vector.shape_cast %9 : vector<1x128x128xbf16> to vector<128x128xbf16>
    %cst_10 = arith.constant dense<0.000000e+00> : vector<7x128xf32>
    %11 = tpu.matmul %8, %10, %cst_10 {dimension_numbers = #tpu.dot_dimension_numbers<[1], [0], [0], [1], [0, 0, 1, 1], [], []>} : vector<7x128xbf16>, vector<128x128xbf16>, vector<7x128xf32> -> vector<7x128xf32>
    %12 = arith.addf %5, %11 : vector<7x128xf32>
    %c0_11 = arith.constant 0 : index
    %c2 = arith.constant 2 : index
    %c0_12 = arith.constant 0 : index
    %13 = tpu.strided_load %arg1[%c0_11, %c2, %c0_12] {strides = array<i32: 1, 2, 1>} : memref<1x16x128xf32, #tpu.memory_space<vmem>>, vector<1x7x128xf32>
    %14 = vector.shape_cast %13 : vector<1x7x128xf32> to vector<7x128xf32>
    %15 = arith.truncf %14 : vector<7x128xf32> to vector<7x128xbf16>
    %c2_13 = arith.constant 2 : index
    %c0_14 = arith.constant 0 : index
    %c0_15 = arith.constant 0 : index
    %16 = vector.load %arg2[%c2_13, %c0_14, %c0_15] : memref<3x128x128xbf16, #tpu.memory_space<vmem>>, vector<1x128x128xbf16>
    %17 = vector.shape_cast %16 : vector<1x128x128xbf16> to vector<128x128xbf16>
    %cst_16 = arith.constant dense<0.000000e+00> : vector<7x128xf32>
    %18 = tpu.matmul %15, %17, %cst_16 {dimension_numbers = #tpu.dot_dimension_numbers<[1], [0], [0], [1], [0, 0, 1, 1], [], []>} : vector<7x128xbf16>, vector<128x128xbf16>, vector<7x128xf32> -> vector<7x128xf32>
    %19 = arith.addf %12, %18 : vector<7x128xf32>
    %c0_17 = arith.constant 0 : index
    %c0_18 = arith.constant 0 : index
    %20 = vector.load %arg3[%c0_17, %c0_18] : memref<1x128xf32, #tpu.memory_space<vmem>>, vector<1x128xf32>
    %21 = vector.broadcast %20 : vector<1x128xf32> to vector<7x128xf32>
    %22 = arith.addf %19, %21 : vector<7x128xf32>
    %cst_19 = arith.constant 0.000000e+00 : f32
    %23 = vector.broadcast %cst_19 : f32 to vector<7x128xf32>
    %24 = arith.maximumf %22, %23 : vector<7x128xf32>
    %c0_20 = arith.constant 0 : index
    %c0_21 = arith.constant 0 : index
    %25 = vector.load %arg13[%c0_20, %c0_21] : memref<8x128xf32, #tpu.memory_space<vmem>>, vector<7x128xf32>
    tpu.vector_store %arg13[%c0_20, %c0_21], %24 {strides = array<i32>} : memref<8x128xf32, #tpu.memory_space<vmem>>, vector<7x128xf32>,
    %c0_22 = arith.constant 0 : index
    %c0_23 = arith.constant 0 : index
    %26 = tpu.strided_load %arg13[%c0_22, %c0_23] {strides = array<i32: 2, 1>} : memref<8x128xf32, #tpu.memory_space<vmem>>, vector<3x128xf32>
    %27 = arith.truncf %26 : vector<3x128xf32> to vector<3x128xbf16>
    %c0_24 = arith.constant 0 : index
    %c0_25 = arith.constant 0 : index
    %c0_26 = arith.constant 0 : index
    %28 = vector.load %arg4[%c0_24, %c0_25, %c0_26] : memref<3x128x128xbf16, #tpu.memory_space<vmem>>, vector<1x128x128xbf16>
    %29 = vector.shape_cast %28 : vector<1x128x128xbf16> to vector<128x128xbf16>
    %cst_27 = arith.constant dense<0.000000e+00> : vector<3x128xf32>
    %30 = tpu.matmul %27, %29, %cst_27 {dimension_numbers = #tpu.dot_dimension_numbers<[1], [0], [0], [1], [0, 0, 1, 1], [], []>} : vector<3x128xbf16>, vector<128x128xbf16>, vector<3x128xf32> -> vector<3x128xf32>
    %c1_28 = arith.constant 1 : index
    %c0_29 = arith.constant 0 : index
    %31 = tpu.strided_load %arg13[%c1_28, %c0_29] {strides = array<i32: 2, 1>} : memref<8x128xf32, #tpu.memory_space<vmem>>, vector<3x128xf32>
    %32 = arith.truncf %31 : vector<3x128xf32> to vector<3x128xbf16>
    %c1_30 = arith.constant 1 : index
    %c0_31 = arith.constant 0 : index
    %c0_32 = arith.constant 0 : index
    %33 = vector.load %arg4[%c1_30, %c0_31, %c0_32] : memref<3x128x128xbf16, #tpu.memory_space<vmem>>, vector<1x128x128xbf16>
    %34 = vector.shape_cast %33 : vector<1x128x128xbf16> to vector<128x128xbf16>
    %cst_33 = arith.constant dense<0.000000e+00> : vector<3x128xf32>
    %35 = tpu.matmul %32, %34, %cst_33 {dimension_numbers = #tpu.dot_dimension_numbers<[1], [0], [0], [1], [0, 0, 1, 1], [], []>} : vector<3x128xbf16>, vector<128x128xbf16>, vector<3x128xf32> -> vector<3x128xf32>
    %36 = arith.addf %30, %35 : vector<3x128xf32>
    %c2_34 = arith.constant 2 : index
    %c0_35 = arith.constant 0 : index
    %37 = tpu.strided_load %arg13[%c2_34, %c0_35] {strides = array<i32: 2, 1>} : memref<8x128xf32, #tpu.memory_space<vmem>>, vector<3x128xf32>
    %38 = arith.truncf %37 : vector<3x128xf32> to vector<3x128xbf16>
    %c2_36 = arith.constant 2 : index
    %c0_37 = arith.constant 0 : index
    %c0_38 = arith.constant 0 : index
    %39 = vector.load %arg4[%c2_36, %c0_37, %c0_38] : memref<3x128x128xbf16, #tpu.memory_space<vmem>>, vector<1x128x128xbf16>
    %40 = vector.shape_cast %39 : vector<1x128x128xbf16> to vector<128x128xbf16>
    %cst_39 = arith.constant dense<0.000000e+00> : vector<3x128xf32>
    %41 = tpu.matmul %38, %40, %cst_39 {dimension_numbers = #tpu.dot_dimension_numbers<[1], [0], [0], [1], [0, 0, 1, 1], [], []>} : vector<3x128xbf16>, vector<128x128xbf16>, vector<3x128xf32> -> vector<3x128xf32>
    %42 = arith.addf %36, %41 : vector<3x128xf32>
    %c0_40 = arith.constant 0 : index
    %c0_41 = arith.constant 0 : index
    %43 = vector.load %arg5[%c0_40, %c0_41] : memref<1x128xf32, #tpu.memory_space<vmem>>, vector<1x128xf32>
    %44 = vector.broadcast %43 : vector<1x128xf32> to vector<3x128xf32>
    %45 = arith.addf %42, %44 : vector<3x128xf32>
    %cst_42 = arith.constant 0.000000e+00 : f32
    %46 = vector.broadcast %cst_42 : f32 to vector<3x128xf32>
    %47 = arith.maximumf %45, %46 : vector<3x128xf32>
    %c0_43 = arith.constant 0 : index
    %c0_44 = arith.constant 0 : index
    %48 = vector.load %arg14[%c0_43, %c0_44] : memref<8x128xf32, #tpu.memory_space<vmem>>, vector<3x128xf32>
    tpu.vector_store %arg14[%c0_43, %c0_44], %47 {strides = array<i32>} : memref<8x128xf32, #tpu.memory_space<vmem>>, vector<3x128xf32>,
    %c0_45 = arith.constant 0 : index
    %c0_46 = arith.constant 0 : index
    %49 = vector.load %arg14[%c0_45, %c0_46] : memref<8x128xf32, #tpu.memory_space<vmem>>, vector<1x128xf32>
    %50 = arith.truncf %49 : vector<1x128xf32> to vector<1x128xbf16>
    %c0_47 = arith.constant 0 : index
    %c0_48 = arith.constant 0 : index
    %c0_49 = arith.constant 0 : index
    %51 = vector.load %arg6[%c0_47, %c0_48, %c0_49] : memref<3x128x128xbf16, #tpu.memory_space<vmem>>, vector<1x128x128xbf16>
    %52 = vector.shape_cast %51 : vector<1x128x128xbf16> to vector<128x128xbf16>
    %cst_50 = arith.constant dense<0.000000e+00> : vector<1x128xf32>
    %53 = tpu.matmul %50, %52, %cst_50 {dimension_numbers = #tpu.dot_dimension_numbers<[1], [0], [0], [1], [0, 0, 1, 1], [], []>} : vector<1x128xbf16>, vector<128x128xbf16>, vector<1x128xf32> -> vector<1x128xf32>
    %c1_51 = arith.constant 1 : index
    %c0_52 = arith.constant 0 : index
    %54 = vector.load %arg14[%c1_51, %c0_52] : memref<8x128xf32, #tpu.memory_space<vmem>>, vector<1x128xf32>
    %55 = arith.truncf %54 : vector<1x128xf32> to vector<1x128xbf16>
    %c1_53 = arith.constant 1 : index
    %c0_54 = arith.constant 0 : index
    %c0_55 = arith.constant 0 : index
    %56 = vector.load %arg6[%c1_53, %c0_54, %c0_55] : memref<3x128x128xbf16, #tpu.memory_space<vmem>>, vector<1x128x128xbf16>
    %57 = vector.shape_cast %56 : vector<1x128x128xbf16> to vector<128x128xbf16>
    %cst_56 = arith.constant dense<0.000000e+00> : vector<1x128xf32>
    %58 = tpu.matmul %55, %57, %cst_56 {dimension_numbers = #tpu.dot_dimension_numbers<[1], [0], [0], [1], [0, 0, 1, 1], [], []>} : vector<1x128xbf16>, vector<128x128xbf16>, vector<1x128xf32> -> vector<1x128xf32>
    %59 = arith.addf %53, %58 : vector<1x128xf32>
    %c2_57 = arith.constant 2 : index
    %c0_58 = arith.constant 0 : index
    %60 = vector.load %arg14[%c2_57, %c0_58] : memref<8x128xf32, #tpu.memory_space<vmem>>, vector<1x128xf32>
    %61 = arith.truncf %60 : vector<1x128xf32> to vector<1x128xbf16>
    %c2_59 = arith.constant 2 : index
    %c0_60 = arith.constant 0 : index
    %c0_61 = arith.constant 0 : index
    %62 = vector.load %arg6[%c2_59, %c0_60, %c0_61] : memref<3x128x128xbf16, #tpu.memory_space<vmem>>, vector<1x128x128xbf16>
    %63 = vector.shape_cast %62 : vector<1x128x128xbf16> to vector<128x128xbf16>
    %cst_62 = arith.constant dense<0.000000e+00> : vector<1x128xf32>
    %64 = tpu.matmul %61, %63, %cst_62 {dimension_numbers = #tpu.dot_dimension_numbers<[1], [0], [0], [1], [0, 0, 1, 1], [], []>} : vector<1x128xbf16>, vector<128x128xbf16>, vector<1x128xf32> -> vector<1x128xf32>
    %65 = arith.addf %59, %64 : vector<1x128xf32>
    %c0_63 = arith.constant 0 : index
    %c0_64 = arith.constant 0 : index
    %66 = vector.load %arg7[%c0_63, %c0_64] : memref<1x128xf32, #tpu.memory_space<vmem>>, vector<1x128xf32>
    %67 = arith.addf %65, %66 : vector<1x128xf32>
    %cst_65 = arith.constant 0.000000e+00 : f32
    %68 = vector.broadcast %cst_65 : f32 to vector<1x128xf32>
    %69 = arith.maximumf %67, %68 : vector<1x128xf32>
    %70 = arith.truncf %69 : vector<1x128xf32> to vector<1x128xbf16>
    %c0_66 = arith.constant 0 : index
    %c0_67 = arith.constant 0 : index
    %71 = vector.load %arg8[%c0_66, %c0_67] : memref<128x128xbf16, #tpu.memory_space<vmem>>, vector<128x128xbf16>
    %cst_68 = arith.constant dense<0.000000e+00> : vector<1x128xf32>
    %72 = tpu.matmul %70, %71, %cst_68 {dimension_numbers = #tpu.dot_dimension_numbers<[1], [0], [0], [1], [0, 0, 1, 1], [], []>} : vector<1x128xbf16>, vector<128x128xbf16>, vector<1x128xf32> -> vector<1x128xf32>
    %c0_69 = arith.constant 0 : index
    %c0_70 = arith.constant 0 : index
    %73 = vector.load %arg9[%c0_69, %c0_70] : memref<1x128xf32, #tpu.memory_space<vmem>>, vector<1x128xf32>
    %74 = arith.addf %72, %73 : vector<1x128xf32>
    %75 = arith.index_cast %arg0 : i32 to index
    %c0_71 = arith.constant 0 : index
    %76 = vector.load %arg12[%75, %c0_71] : memref<2x128xf32, #tpu.memory_space<vmem>>, vector<1x128xf32>
    tpu.vector_store %arg12[%75, %c0_71], %74 {strides = array<i32>} : memref<2x128xf32, #tpu.memory_space<vmem>>, vector<1x128xf32>,
    %c1_i32 = arith.constant 1 : i32
    %77 = arith.cmpi eq, %arg0, %c1_i32 : i32
    %78 = arith.extui %77 : i1 to i32
    %c0_i32 = arith.constant 0 : i32
    %79 = arith.cmpi ne, %78, %c0_i32 : i32
    scf.if %79 {
      %c0_72 = arith.constant 0 : index
      %c0_73 = arith.constant 0 : index
      %80 = vector.load %arg12[%c0_72, %c0_73] : memref<2x128xf32, #tpu.memory_space<vmem>>, vector<2x128xf32>
      %c0_74 = arith.constant 0 : index
      %c0_75 = arith.constant 0 : index
      %81 = vector.load %arg10[%c0_74, %c0_75] : memref<1x128xf32, #tpu.memory_space<vmem>>, vector<1x128xf32>
      %82 = vector.broadcast %81 : vector<1x128xf32> to vector<2x128xf32>
      %83 = arith.mulf %80, %82 : vector<2x128xf32>
      %84 = vector.shape_cast %83 : vector<2x128xf32> to vector<1x2x128xf32>
      %cst_76 = arith.constant dense<0.000000e+00> : vector<1xf32>
      %85 = vector.multi_reduction <add>, %84, %cst_76 [1, 2] : vector<1x2x128xf32> to vector<1xf32>
      %86 = vector.shape_cast %85 : vector<1xf32> to vector<1x1x1xf32>
      %87 = vector.extract %86[0, 0, 0] : f32 from vector<1x1x1xf32>
      %cst_77 = arith.constant 0.0833333358 : f32
      %88 = arith.mulf %87, %cst_77 : f32
      %89 = vector.broadcast %88 : f32 to vector<2x128xf32>
      %90 = arith.subf %80, %89 : vector<2x128xf32>
      %c0_78 = arith.constant 0 : index
      %c0_79 = arith.constant 0 : index
      %91 = vector.load %arg11[%c0_78, %c0_79] : memref<1x128xf32, #tpu.memory_space<vmem>>, vector<1x128xf32>
      %92 = vector.broadcast %91 : vector<1x128xf32> to vector<2x128xf32>
      %93 = arith.mulf %90, %92 : vector<2x128xf32>
      %c0_80 = arith.constant 0 : index
      %c0_81 = arith.constant 0 : index
      %94 = vector.load %arg12[%c0_80, %c0_81] : memref<2x128xf32, #tpu.memory_space<vmem>>, vector<2x128xf32>
      tpu.vector_store %arg12[%c0_80, %c0_81], %93 {strides = array<i32>} : memref<2x128xf32, #tpu.memory_space<vmem>>, vector<2x128xf32>,
    } else {
    }
    return
  }
  func.func @transform_0(%arg0: i32) -> (i32, i32, i32) {
    %c0_i32 = arith.constant 0 : i32
    %c0_i32_0 = arith.constant 0 : i32
    %c0_i32_1 = arith.constant 0 : i32
    return %arg0, %c0_i32, %c0_i32_0 : i32, i32, i32
  }
  func.func @transform_1(%arg0: i32) -> (i32, i32, i32) {
    %c0_i32 = arith.constant 0 : i32
    %c0_i32_0 = arith.constant 0 : i32
    %c0_i32_1 = arith.constant 0 : i32
    %c0_i32_2 = arith.constant 0 : i32
    return %c0_i32, %c0_i32_0, %c0_i32_1 : i32, i32, i32
  }
  func.func @transform_2(%arg0: i32) -> (i32, i32) {
    %c0_i32 = arith.constant 0 : i32
    %c0_i32_0 = arith.constant 0 : i32
    %c0_i32_1 = arith.constant 0 : i32
    return %c0_i32, %c0_i32_0 : i32, i32
  }
  func.func @transform_3(%arg0: i32) -> (i32, i32, i32) {
    %c0_i32 = arith.constant 0 : i32
    %c0_i32_0 = arith.constant 0 : i32
    %c0_i32_1 = arith.constant 0 : i32
    %c0_i32_2 = arith.constant 0 : i32
    return %c0_i32, %c0_i32_0, %c0_i32_1 : i32, i32, i32
  }
  func.func @transform_4(%arg0: i32) -> (i32, i32) {
    %c0_i32 = arith.constant 0 : i32
    %c0_i32_0 = arith.constant 0 : i32
    %c0_i32_1 = arith.constant 0 : i32
    return %c0_i32, %c0_i32_0 : i32, i32
  }
  func.func @transform_5(%arg0: i32) -> (i32, i32, i32) {
    %c0_i32 = arith.constant 0 : i32
    %c0_i32_0 = arith.constant 0 : i32
    %c0_i32_1 = arith.constant 0 : i32
    %c0_i32_2 = arith.constant 0 : i32
    return %c0_i32, %c0_i32_0, %c0_i32_1 : i32, i32, i32
  }
  func.func @transform_6(%arg0: i32) -> (i32, i32) {
    %c0_i32 = arith.constant 0 : i32
    %c0_i32_0 = arith.constant 0 : i32
    %c0_i32_1 = arith.constant 0 : i32
    return %c0_i32, %c0_i32_0 : i32, i32
  }
  func.func @transform_7(%arg0: i32) -> (i32, i32) {
    %c0_i32 = arith.constant 0 : i32
    %c0_i32_0 = arith.constant 0 : i32
    %c0_i32_1 = arith.constant 0 : i32
    return %c0_i32, %c0_i32_0 : i32, i32
  }
  func.func @transform_8(%arg0: i32) -> (i32, i32) {
    %c0_i32 = arith.constant 0 : i32
    %c0_i32_0 = arith.constant 0 : i32
    %c0_i32_1 = arith.constant 0 : i32
    return %c0_i32, %c0_i32_0 : i32, i32
  }
  func.func @transform_9(%arg0: i32) -> (i32, i32) {
    %c0_i32 = arith.constant 0 : i32
    %c0_i32_0 = arith.constant 0 : i32
    %c0_i32_1 = arith.constant 0 : i32
    return %c0_i32, %c0_i32_0 : i32, i32
  }
  func.func @transform_10(%arg0: i32) -> (i32, i32) {
    %c0_i32 = arith.constant 0 : i32
    %c0_i32_0 = arith.constant 0 : i32
    %c0_i32_1 = arith.constant 0 : i32
    return %c0_i32, %c0_i32_0 : i32, i32
  }
  func.func @transform_11(%arg0: i32) -> (i32, i32) {
    %c0_i32 = arith.constant 0 : i32
    %c0_i32_0 = arith.constant 0 : i32
    %c0_i32_1 = arith.constant 0 : i32
    return %c0_i32, %c0_i32_0 : i32, i32
  }
}

</mosaic_0001>

<bundles_post_ra>
// kernel: _forward.1
= control target key start
LH: loop header
LB: loop body
LE: loop exit
PB: predicated region body
PF: predicated region fallthrough
CT: control target
= control target key end

     0   :  { %16 = vsyncpa [#allocation5], 0  ;;  %s2173_s0 = inlined_call_operand.vmem [shape: f32[2,16,128], index: 0, kind: input, shape index: {}]   ;;  %s2174_s1 = inlined_call_operand.vmem [shape: bf16[3,128,128], index: 1, kind: input, shape index: {}]   ;;  %s2175_s2 = inlined_call_operand.vmem [shape: f32[1,128], index: 2, kind: input, shape index: {}]   ;;  %s2176_s3 = inlined_call_operand.vmem [shape: bf16[3,128,128], index: 3, kind: input, shape index: {}]   ;;  %s2177_s4 = inlined_call_operand.vmem [shape: f32[1,128], index: 4, kind: input, shape index: {}]   ;;  %s2178_s5 = inlined_call_operand.hbm [shape: bf16[3,128,128], index: 5, kind: input, shape index: {}]   ;;  %s2179_s6 = inlined_call_operand.vmem [shape: f32[1,128], index: 6, kind: input, shape index: {}]   ;;  %s2180_s7 = inlined_call_operand.vmem [shape: bf16[128,128], index: 7, kind: input, shape index: {}]   ;;  %s2181_s8 = inlined_call_operand.vmem [shape: f32[1,128], index: 8, kind: input, shape index: {}]   ;;  %s2182_s9 = inlined_call_operand.vmem [shape: f32[1,128], index: 9, kind: input, shape index: {}]   ;;  %s2183_s10 = inlined_call_operand.vmem [shape: f32[1,128], index: 10, kind: input, shape index: {}]   ;;  %s2184_s11 = inlined_call_operand.hbm [shape: f32[2,128], index: 11, kind: output, shape index: {}]  }
   0x1   :  { %17 = vsyncpa [#allocation6], 0  ;;  %s1959_s17 = smov 0  }
   0x2 LB: > { %s308_s20 = sshll.u32 %s2178_s5, 4  ;;  %s1968_s21 = sadd.s32 4294967295, %s1893_s17   ;;  %s1893_s17 = sphi %s1959_s17, %s23_s17   ;;  %s309_s20 = int_to_ptr.hbm [resolvable:$true] %s308_s20 }
   0x3   : > { %p1304_p0 = scmp.ge.s32.totalorder %s1893_s17, 1  ;;  %p285_p1 = scmp.lt.s32.totalorder %s1893_s17, 3 }
   0x4   : > { %p1801_p2 = scmp.eq.s32.totalorder %s1968_s21, 0  ;;  %s1895_s22 = smov [#allocation4]  }
   0x5   : > { %p286_p3 = pnand %p1304_p0, %p285_p1  ;;  %s310_s23 = sshll.u32 %s1895_s22, 4  ;;  %s311_s23 = int_to_ptr.vmem [resolvable:$true] %s310_s23 }
   0x6   : > { %s1896_s24 = smov 64   ;;  %s1897_s25 = smov 4  }
   0x7   : > { %p1797_p4 = pneg %p286_p3  ;;  %349 = sbr.rel (%p286_p3) target bundleno = 817 (0x331), region = 64 }
   0x9   : > { %p1798_p5 = pnand %p1801_p2, %p1797_p4 }
   0xb   : > { %1800 = dma.hbm_to_vmem [thread:$0]  (!%p1798_p5), %s309_s20, 3072, %s311_s23, [#allocation5], %s1896_s24, %s1896_s24, %s1897_s25  }
   0xc   : > { %1884 = dma.done.wait (%p1801_p2), [#allocation5], 3072  }
   0xd   : > { %1886 = vsyncadd (%p1801_p2), [#allocation5], 4294964224  ;;  %v1719_v0 = vld [vmem:[%s2174_s1 + $0x78] sm:$0xff]  ;;  %v1718_v3 = vld [vmem:[%s2174_s1 + $0x70] sm:$0xff]  ;;  %p385_p6 = scmp.lt.s32.totalorder %s1968_s21, 1  ;;  %s1784_s13 = scalar_lea.vmem [#allocation7], %s1893_s17 }
   0xe   : > { %v1711_v1 = vld [vmem:[%s2174_s1 + $0x38] sm:$0xff]  ;;  %476 = vmatpush.bf16.msra.mxu0 %v1719_v0  ;;  %v1710_v4 = vld [vmem:[%s2174_s1 + $0x30] sm:$0xff]  ;;  %v1717_v6 = vld [vmem:[%s2174_s1 + $0x68] sm:$0xff]  ;;  %p1698_p7 = scmp.ne.s32.totalorder %s1968_s21, 1 }
   0xf   : > { %v1727_v2 = vld [vmem:[%s2174_s1 + $0xb8] sm:$0xff]  ;;  %537 = vmatpush.bf16.msra.mxu1 %v1711_v1  ;;  %v1726_v5 = vld [vmem:[%s2174_s1 + $0xb0] sm:$0xff]  ;;  %v1709_v7 = vld [vmem:[%s2174_s1 + $0x28] sm:$0xff]  ;;  %s386_s26 = scalar_select %p385_p6, %s1968_s21, 1 }
  0x10   : > { %618 = vmatpush.bf16.msra.mxu2 %v1727_v2  ;;  %v1725_v8 = vld [vmem:[%s2174_s1 + $0xa8] sm:$0xff]  ;;  %v1743_v9 = vld [vmem:[%s2176_s3 + $0x78] sm:$0xff]  ;;  %v1716_v10 = vld [vmem:[%s2174_s1 + $0x60] sm:$0xff] }
  0x11   : > { %v1708_v11 = vld [vmem:[%s2174_s1 + $0x20] sm:$0xff]  ;;  %725 = vmatpush.bf16.msra.mxu3 %v1743_v9  ;;  %v1742_v13 = vld [vmem:[%s2176_s3 + $0x70] sm:$0xff]  ;;  %v1715_v14 = vld [vmem:[%s2174_s1 + $0x58] sm:$0xff]  ;;  %s1703_s14 = sshll.u32 %s386_s26, 4 }
  0x12   : > { %477 = vmatpush.bf16.msra.mxu0 %v1718_v3  ;;  %v1724_v12 = vld [vmem:[%s2174_s1 + $0xa0] sm:$0xff]  ;;  %v1707_v15 = vld [vmem:[%s2174_s1 + $0x18] sm:$0xff]  ;;  %v1714_v17 = vld [vmem:[%s2174_s1 + $0x50] sm:$0xff]  ;;  %s389_s25 = scalar_lea.vmem %s2173_s0, %s1703_s14 }
  0x13   : > { %538 = vmatpush.bf16.msra.mxu1 %v1710_v4  ;;  %v1723_v16 = vld [vmem:[%s2174_s1 + $0x98] sm:$0xff]  ;;  %v1706_v18 = vld [vmem:[%s2174_s1 + $0x10] sm:$0xff]  ;;  %v1713_v20 = vld [vmem:[%s2174_s1 + $0x48] sm:$0xff] }
  0x14   : > { %619 = vmatpush.bf16.msra.mxu2 %v1726_v5  ;;  %v1722_v19 = vld [vmem:[%s2174_s1 + $0x90] sm:$0xff]  ;;  %v1705_v21 = vld [vmem:[%s2174_s1 + $0x8] sm:$0xff]  ;;  %v1712_v23 = vld [vmem:[%s2174_s1 + $0x40] sm:$0xff] }
  0x15   : > { %726 = vmatpush.bf16.msra.mxu3 %v1742_v13  ;;  %v1721_v22 = vld [vmem:[%s2174_s1 + $0x88] sm:$0xff]  ;;  %v1704_v24 = vld [vmem:[%s2174_s1] sm:$0xff]  ;;  %v1735_v29 = vld [vmem:[%s2176_s3 + $0x38] sm:$0xff] }
  0x16   : > { %478 = vmatpush.bf16.msra.mxu0 %v1717_v6  ;;  %v1311_v25 = vld [vmem:[%s389_s25 + $0x1] ss:$2 sm:$0x7f]  ;;  %v390_v26 = vld [vmem:[%s389_s25] ss:$2 sm:$0x7f] }
  0x17   : > { %539 = vmatpush.bf16.msra.mxu1 %v1709_v7  ;;  %v1720_v27 = vld [vmem:[%s2174_s1 + $0x80] sm:$0xff]  ;;  %v1751_v30 = vld [vmem:[%s2176_s3 + $0xb8] sm:$0xff]  ;;  %v410_v31 = vpack.c.bf16 %v1311_v25, %v1311_v25  ;;  %v391_v32 = vpack.c.bf16 %v390_v26, %v390_v26  ;;  %v1734_v34 = vld [vmem:[%s2176_s3 + $0x30] sm:$0xff] }
  0x18   : > { %620 = vmatpush.bf16.msra.mxu2 %v1725_v8  ;;  %v1392_v28 = vld [vmem:[%s389_s25 + $0x2] ss:$2 sm:$0x7f]  ;;  %v1750_v35 = vld [vmem:[%s2176_s3 + $0xb0] sm:$0xff]  ;;  %v1739_v42 = vld [vmem:[%s2176_s3 + $0x58] sm:$0xff] }
  0x19   : > { %v552_v33 = vpack.c.bf16 %v1392_v28, %v1392_v28  ;;  %v1741_v36 = vld [vmem:[%s2176_s3 + $0x68] sm:$0xff]  ;;  %v1740_v39 = vld [vmem:[%s2176_s3 + $0x60] sm:$0xff]  ;;  %v1731_v43 = vld [vmem:[%s2176_s3 + $0x18] sm:$0xff] }
  0x1a   : > { %479 = vmatpush.bf16.msra.mxu0 %v1716_v10  ;;  %v1733_v37 = vld [vmem:[%s2176_s3 + $0x28] sm:$0xff]  ;;  %727 = vmatpush.bf16.msra.mxu3 %v1741_v36  ;;  %v1732_v40 = vld [vmem:[%s2176_s3 + $0x20] sm:$0xff]  ;;  %v1747_v44 = vld [vmem:[%s2176_s3 + $0x98] sm:$0xff] }
  0x1b   : > { %540 = vmatpush.bf16.msra.mxu1 %v1708_v11  ;;  %v1749_v38 = vld [vmem:[%s2176_s3 + $0xa8] sm:$0xff]  ;;  %v1748_v41 = vld [vmem:[%s2176_s3 + $0xa0] sm:$0xff]  ;;  %v1738_v45 = vld [vmem:[%s2176_s3 + $0x50] sm:$0xff] }
  0x1c   : > { %621 = vmatpush.bf16.msra.mxu2 %v1724_v12  ;;  %v1730_v46 = vld [vmem:[%s2176_s3 + $0x10] sm:$0xff]  ;;  %v1737_v48 = vld [vmem:[%s2176_s3 + $0x48] sm:$0xff]  ;;  %v1736_v51 = vld [vmem:[%s2176_s3 + $0x40] sm:$0xff] }
  0x1d   : > { %v1746_v47 = vld [vmem:[%s2176_s3 + $0x90] sm:$0xff]  ;;  %v1729_v49 = vld [vmem:[%s2176_s3 + $0x8] sm:$0xff]  ;;  %v1728_v52 = vld [vmem:[%s2176_s3] sm:$0xff] }
  0x1e   : > { %480 = vmatpush.bf16.msra.mxu0 %v1715_v14  ;;  %728 = vmatpush.bf16.msra.mxu3 %v1740_v39  ;;  %v1745_v50 = vld [vmem:[%s2176_s3 + $0x88] sm:$0xff]  ;;  %v1744_v53 = vld [vmem:[%s2176_s3 + $0x80] sm:$0xff]  ;;  %v1765_v13 = vld [vmem:[#allocation4 + $0x68] sm:$0xff] }
  0x1f   : > { %541 = vmatpush.bf16.msra.mxu1 %v1707_v15  ;;  %v1767_v54 = vld [vmem:[#allocation4 + $0x78] sm:$0xff]  ;;  %v1766_v57 = vld [vmem:[#allocation4 + $0x70] sm:$0xff]  ;;  %v1757_v14 = vld [vmem:[#allocation4 + $0x28] sm:$0xff] }
  0x20   : > { %622 = vmatpush.bf16.msra.mxu2 %v1723_v16  ;;  %v1759_v55 = vld [vmem:[#allocation4 + $0x38] sm:$0xff]  ;;  %v1758_v58 = vld [vmem:[#allocation4 + $0x30] sm:$0xff]  ;;  %v1773_v15 = vld [vmem:[#allocation4 + $0xa8] sm:$0xff] }
  0x21   : > { %v1775_v56 = vld [vmem:[#allocation4 + $0xb8] sm:$0xff]  ;;  %v1774_v59 = vld [vmem:[#allocation4 + $0xb0] sm:$0xff]  ;;  %v1764_v16 = vld [vmem:[#allocation4 + $0x60] sm:$0xff] }
  0x22   : > { %481 = vmatpush.bf16.msra.mxu0 %v1714_v17  ;;  %729 = vmatpush.bf16.msra.mxu3 %v1739_v42  ;;  %v1817_v63 = vld [vmem:[%s2175_s2] ss:$0 sm:$0xff]  ;;  %v1756_v17 = vld [vmem:[#allocation4 + $0x20] sm:$0xff]  ;;  %v1761_v25 = vld [vmem:[#allocation4 + $0x48] sm:$0xff] }
  0x23   : > { %542 = vmatpush.bf16.msra.mxu1 %v1706_v18  ;;  %v1772_v18 = vld [vmem:[#allocation4 + $0xa0] sm:$0xff]  ;;  %v1753_v26 = vld [vmem:[#allocation4 + $0x8] sm:$0xff]  ;;  %v1780_v36 = vld [vmem:[%s2180_s7 + $0x20] sm:$0xff] }
  0x24   : > { %623 = vmatpush.bf16.msra.mxu2 %v1722_v19  ;;  %v1763_v19 = vld [vmem:[#allocation4 + $0x58] sm:$0xff]  ;;  %v1760_v28 = vld [vmem:[#allocation4 + $0x40] sm:$0xff]  ;;  %v1818_v39 = vld [vmem:[%s2177_s4] ss:$0 sm:$0xff] }
  0x26   : > { %482 = vmatpush.bf16.msra.mxu0 %v1713_v20  ;;  %730 = vmatpush.bf16.msra.mxu3 %v1738_v45  ;;  %v1755_v20 = vld [vmem:[#allocation4 + $0x18] sm:$0xff] }
  0x27   : > { %543 = vmatpush.bf16.msra.mxu1 %v1705_v21  ;;  %v1771_v21 = vld [vmem:[#allocation4 + $0x98] sm:$0xff] }
  0x28   : > { %624 = vmatpush.bf16.msra.mxu2 %v1721_v22  ;;  %v1762_v22 = vld [vmem:[#allocation4 + $0x50] sm:$0xff] }
  0x2a   : > { %483 = vmatpush.bf16.msra.mxu0 %v1712_v23  ;;  %731 = vmatpush.bf16.msra.mxu3 %v1737_v48  ;;  %v1754_v23 = vld [vmem:[#allocation4 + $0x10] sm:$0xff] }
  0x2b   : > { %544 = vmatpush.bf16.msra.mxu1 %v1704_v24  ;;  %v1770_v24 = vld [vmem:[#allocation4 + $0x90] sm:$0xff] }
  0x2c   : > { %625 = vmatpush.bf16.msra.mxu2 %v1720_v27  ;;  %v1769_v27 = vld [vmem:[#allocation4 + $0x88] sm:$0xff] }
  0x2d   : > { %484 = vmatmul.bf16.vlgmr.msra.gmra.mxu0 %v410_v31  ;;  %v1783_v31 = vld [vmem:[%s2180_s7 + $0x38] sm:$0xff] }
  0x2e   : > { %786 = vmatpush.bf16.msrb.mxu0 %v1735_v29  ;;  %545 = vmatmul.bf16.vlgmr.msra.gmra.mxu1 %v391_v32  ;;  %v1752_v29 = vld [vmem:[#allocation4] sm:$0xff] }
  0x2f   : > { %867 = vmatpush.bf16.msrb.mxu1 %v1751_v30  ;;  %626 = vmatmul.bf16.vlgmr.msra.gmra.mxu2 %v552_v33  ;;  %v1768_v30 = vld [vmem:[#allocation4 + $0x80] sm:$0xff] }
  0x30   : > { %732 = vmatpush.bf16.msra.mxu3 %v1736_v51  ;;  %973 = vmatpush.bf16.msrb.mxu2 %v1767_v54  ;;  %v1782_v32 = vld [vmem:[%s2180_s7 + $0x30] sm:$0xff]  ;;  %v1777_v54 = vld [vmem:[%s2180_s7 + $0x8] sm:$0xff] }
  0x32   : > { %787 = vmatpush.bf16.msrb.mxu0 %v1734_v34  ;;  %v1781_v34 = vld [vmem:[%s2180_s7 + $0x28] sm:$0xff] }
  0x33   : > { %868 = vmatpush.bf16.msrb.mxu1 %v1750_v35 }
  0x34   : > { %1034 = vmatpush.bf16.msrb.mxu3 %v1759_v55  ;;  %974 = vmatpush.bf16.msrb.mxu2 %v1766_v57  ;;  %v1776_v55 = vld [vmem:[%s2180_s7] sm:$0xff] }
  0x36   : > { %788 = vmatpush.bf16.msrb.mxu0 %v1733_v37 }
  0x37   : > { %869 = vmatpush.bf16.msrb.mxu1 %v1749_v38 }
  0x38   : > { %1035 = vmatpush.bf16.msrb.mxu3 %v1758_v58  ;;  %975 = vmatpush.bf16.msrb.mxu2 %v1765_v13 }
  0x3a   : > { %789 = vmatpush.bf16.msrb.mxu0 %v1732_v40 }
  0x3b   : > { %870 = vmatpush.bf16.msrb.mxu1 %v1748_v41 }
  0x3c   : > { %1036 = vmatpush.bf16.msrb.mxu3 %v1757_v14  ;;  %976 = vmatpush.bf16.msrb.mxu2 %v1764_v16 }
  0x3e   : > { %790 = vmatpush.bf16.msrb.mxu0 %v1731_v43 }
  0x3f   : > { %871 = vmatpush.bf16.msrb.mxu1 %v1747_v44 }
  0x40   : > { %1037 = vmatpush.bf16.msrb.mxu3 %v1756_v17  ;;  %977 = vmatpush.bf16.msrb.mxu2 %v1763_v19 }
  0x42   : > { %791 = vmatpush.bf16.msrb.mxu0 %v1730_v46 }
  0x43   : > { %872 = vmatpush.bf16.msrb.mxu1 %v1746_v47 }
  0x44   : > { %1038 = vmatpush.bf16.msrb.mxu3 %v1755_v20  ;;  %978 = vmatpush.bf16.msrb.mxu2 %v1762_v22 }
  0x46   : > { %792 = vmatpush.bf16.msrb.mxu0 %v1729_v49 }
  0x47   : > { %873 = vmatpush.bf16.msrb.mxu1 %v1745_v50 }
  0x48   : > { %1039 = vmatpush.bf16.msrb.mxu3 %v1754_v23  ;;  %979 = vmatpush.bf16.msrb.mxu2 %v1761_v25 }
  0x4a   : > { %793 = vmatpush.bf16.msrb.mxu0 %v1728_v52  ;;  %v1779_v52 = vld [vmem:[%s2180_s7 + $0x18] sm:$0xff] }
  0x4b   : > { %874 = vmatpush.bf16.msrb.mxu1 %v1744_v53  ;;  %v1778_v53 = vld [vmem:[%s2180_s7 + $0x10] sm:$0xff] }
  0x4c   : > { %1040 = vmatpush.bf16.msrb.mxu3 %v1753_v26  ;;  %980 = vmatpush.bf16.msrb.mxu2 %v1760_v28 }
  0x4e   : > { %1114 = vmatpush.bf16.msra.mxu0 %v1775_v56 }
  0x4f   : > { %1197 = vmatpush.bf16.msra.mxu1 %v1783_v31 }
  0x50   : > { %1041 = vmatpush.bf16.msrb.mxu3 %v1752_v29 }
  0x52   : > { %1115 = vmatpush.bf16.msra.mxu0 %v1774_v59 }
  0x53   : > { %1198 = vmatpush.bf16.msra.mxu1 %v1782_v32 }
  0x56   : > { %1116 = vmatpush.bf16.msra.mxu0 %v1773_v15 }
  0x57   : > { %1199 = vmatpush.bf16.msra.mxu1 %v1781_v34 }
  0x5a   : > { %1117 = vmatpush.bf16.msra.mxu0 %v1772_v18 }
  0x5b   : > { %1200 = vmatpush.bf16.msra.mxu1 %v1780_v36 }
  0x5e   : > { %1118 = vmatpush.bf16.msra.mxu0 %v1771_v21 }
  0x5f   : > { %1201 = vmatpush.bf16.msra.mxu1 %v1779_v52 }
  0x62   : > { %1119 = vmatpush.bf16.msra.mxu0 %v1770_v24 }
  0x63   : > { %1202 = vmatpush.bf16.msra.mxu1 %v1778_v53 }
  0x66   : > { %1120 = vmatpush.bf16.msra.mxu0 %v1769_v27 }
  0x67   : > { %1203 = vmatpush.bf16.msra.mxu1 %v1777_v54 }
  0x6a   : > { %1121 = vmatpush.bf16.msra.mxu0 %v1768_v30 }
  0x6b   : > { %1204 = vmatpush.bf16.msra.mxu1 %v1776_v55 }
  0xaa   : > { %v485_v60 = vpop.f32.mrf.mxu0 }
  0xab   : > { %v546_v61 = vpop.f32.mrf.mxu1 }
  0xac   : > { %v547_v62 = vadd.f32 %v546_v61, %v485_v60  ;;  %v1128_v60 = vld [vmem:[%s2179_s6] sm:$0x1] }
  0xb2   : > { %v627_v0 = vpop.f32.mrf.mxu2  ;;  %v487_v2 = vpop.f32.mrf.mxu0 }
  0xb3   : > { %v631_v1 = vadd.f32 %v627_v0, %v547_v62  ;;  %v548_v3 = vpop.f32.mrf.mxu1 }
  0xb5   : > { %v636_v4 = vadd.f32 %v1817_v63, %v631_v1 }
  0xb7   : > { %v637_v5 = vmax.f32 %v636_v4, 0.0  ;;  %v1148_v4 = vld [vmem:[%s2181_s8] sm:$0x1] }
  0xb9   : > { %638 = vst [vmem:[#allocation2] sm:$0x7f] %v637_v5 }
  0xba   : > { %v629_v6 = vpop.f32.mrf.mxu2 }
  0xc0   : > { %v658_v7 = vld [vmem:[#allocation2 + $0x1] ss:$2 sm:$0x7]  ;;  %v639_v8 = vld [vmem:[#allocation2] ss:$2 sm:$0x7] }
  0xc1   : > { %v659_v9 = vpack.c.bf16 %v658_v7, %v658_v7  ;;  %v640_v10 = vpack.c.bf16 %v639_v8, %v639_v8  ;;  %v800_v11 = vld [vmem:[#allocation2 + $0x2] ss:$2 sm:$0x7] }
  0xc2   : > { %v801_v12 = vpack.c.bf16 %v800_v11, %v800_v11 }
  0xc3   : > { %733 = vmatmul.bf16.vlgmr.msra.gmra.mxu3 %v659_v9  ;;  %794 = vmatmul.bf16.vlgmr.msrb.gmra.mxu0 %v640_v10 }
  0xc4   : > { %875 = vmatmul.bf16.vlgmr.msrb.gmra.mxu1 %v801_v12 }
 0x140   : > { %v795_v33 = vpop.f32.mrf.mxu0 }
 0x141   : > { %v876_v35 = vpop.f32.mrf.mxu1 }
 0x146   : > { %v734_v37 = vpop.f32.mrf.mxu3 }
 0x147   : > { %v796_v38 = vadd.f32 %v795_v33, %v734_v37 }
 0x148   : > { %v797_v40 = vpop.f32.mrf.mxu0 }
 0x149   : > { %v880_v41 = vadd.f32 %v876_v35, %v796_v38  ;;  %v878_v42 = vpop.f32.mrf.mxu1 }
 0x14b   : > { %v885_v43 = vadd.f32 %v1818_v39, %v880_v41 }
 0x14d   : > { %v886_v44 = vmax.f32 %v885_v43, 0.0 }
 0x14e   : > { %v736_v45 = vpop.f32.mrf.mxu3 }
 0x14f   : > { %887 = vst [vmem:[#allocation3] sm:$0x7] %v886_v44 }
 0x156   : > { %v906_v46 = vld [vmem:[#allocation3 + $0x1] sm:$0x1]  ;;  %v888_v47 = vld [vmem:[#allocation3] sm:$0x1]  ;;  %v1047_v48 = vld [vmem:[#allocation3 + $0x2] sm:$0x1] }
 0x157   : > { %v907_v49 = vpack.c.bf16 %v906_v46, %v906_v46  ;;  %v889_v50 = vpack.c.bf16 %v888_v47, %v888_v47  ;;  %v1048_v51 = vpack.c.bf16 %v1047_v48, %v1047_v48 }
 0x159   : > { %981 = vmatmul.bf16.vlgmr.msrb.gmra.mxu2 %v907_v49  ;;  %1042 = vmatmul.bf16.vlgmr.msrb.gmra.mxu3 %v889_v50 }
 0x15a   : > { %1122 = vmatmul.bf16.vlgmr.msra.gmra.mxu0 %v1048_v51 }
 0x1d7   : > { %v1123_v56 = vpop.f32.mrf.mxu0 }
 0x1dc   : > { %v982_v57 = vpop.f32.mrf.mxu2  ;;  %v1043_v58 = vpop.f32.mrf.mxu3 }
 0x1dd   : > { %v1044_v59 = vadd.f32 %v1043_v58, %v982_v57 }
 0x1df   : > { %v1127_v61 = vadd.f32 %v1123_v56, %v1044_v59  ;;  %v1125_v62 = vpop.f32.mrf.mxu0 }
 0x1e1   : > { %v1129_v63 = vadd.f32 %v1128_v60, %v1127_v61 }
 0x1e3   : > { %v1130_v0 = vmax.f32 %v1129_v63, 0.0 }
 0x1e4   : > { %v984_v1 = vpop.f32.mrf.mxu2  ;;  %v1045_v2 = vpop.f32.mrf.mxu3 }
 0x1e5   : > { %v1131_v3 = vpack.c.bf16 %v1130_v0, %v1130_v0 }
 0x1e7   : > { %1205 = vmatmul.bf16.vlgmr.msra.gmra.mxu1 %v1131_v3 }
 0x264   : > { %v1206_v5 = vpop.f32.mrf.mxu1 }
 0x265   : > { %v1207_v6 = vadd.f32 %v1206_v5, %v1148_v4 }
 0x267   : > { %1786 = vst [vmem:[%s1784_s13 - $0x1] sm:$0x1] %v1207_v6 }
 0x268   : > { %1215 = sbr.rel (%p1698_p7) target bundleno = 812 (0x32c), region = 72 }
 0x26c   : > { %v1208_v7 = vpop.f32.mrf.mxu1 }
 0x26d   : > { %v1819_v9 = vld [vmem:[%s2182_s9] ss:$0 sm:$0xff]  ;;  %vm1222_vm0 = vcmask 1041408  }
 0x26e   : > { %v1216_v8 = vld [vmem:[#allocation7] sm:$0x3]  ;;  %v1820_v19 = vld [vmem:[%s2183_s10] ss:$0 sm:$0xff] }
 0x26f   : > { %v1221_v10 = vmul.f32 %v1819_v9, %v1216_v8 }
 0x271   : > { %v1223_v11 = vsel %vm1222_vm0, %v1221_v10, 0.0 }
 0x272   : > { %1224 = vadd.xlane.f32.xlu0 %v1223_v11 }
 0x2e5   : > { %v1225_v12 = vpop.xlane.xlu0 %1224 }
 0x2e6   : > { %v1226_v13 = vrot.slane %v1225_v12, 4 }
 0x2e8   : > { %v1227_v14 = vadd.f32 %v1226_v13, %v1225_v12 }
 0x2ea   : > { %v1228_v15 = vrot.slane %v1227_v14, 2 }
 0x2ec   : > { %v1229_v16 = vadd.f32 %v1228_v15, %v1227_v14 }
 0x2ee   : > { %v1230_v17 = vrot.slane %v1229_v16, 1 }
 0x2f0   : > { %v1231_v18 = vadd.f32 %v1230_v17, %v1229_v16 }
 0x2f2   : > { %1787 = vpush %v1231_v18 }
 0x323   : > { %s1788_s16 = spop %1787 }
 0x324   : > { %s1233_s18 = smul.f32 0.083333336, %s1788_s16 }
 0x326   : > { %v1234_v20 = vstv %s1233_s18 }
 0x327   : > { %v1235_v21 = vsub.f32 %v1216_v8, %v1234_v20 }
 0x329   : > { %v1240_v22 = vmul.f32 %v1820_v19, %v1235_v21 }
 0x32b   : > { %1241 = vst [vmem:[#allocation7] sm:$0x3] %v1240_v22 }
 0x32c PF: > { %p1803_p8 = scmp.eq.s32.totalorder %s1968_s21, 1  ;;  %s1898_s22 = smov [#allocation7]  }
 0x32d   : > { %s1248_s23 = sshll.u32 %s1898_s22, 4  ;;  %s1250_s26 = sshll.u32 %s2184_s11, 4  ;;  %s1249_s23 = int_to_ptr.vmem [resolvable:$true] %s1248_s23  ;;  %s1251_s26 = int_to_ptr.hbm [resolvable:$true] %s1250_s26 }
 0x32e   : > { %1794 = dma.vmem_to_hbm [thread:$0]  (%p1803_p8), %s1249_s23, 32, %s1251_s26, [#allocation6]  }
 0x32f   : > { %1888 = dma.done.wait (%p1803_p8), [#allocation6], 32  }
 0x330   : > { %1890 = vsyncadd (%p1803_p8), [#allocation6], 4294967264 }
 0x331 PF: > { %s23_s17 = sadd.s32 1, %s1893_s17  }
 0x332   : > { %p20_p9 = scmp.ge.s32.totalorder %s23_s17, 4  }
 0x334   :  { %22 = sbr.rel (!%p20_p9) target bundleno = 2 (0x2), region = 111 }
 0x339   :  { %1264 = vsyncpa [#allocation5], 1 }
 0x33a   :  { %1266 = vsyncpa [#allocation5 + $0x1], 1 }
 0x33b   :  { %1267 = vsyncpa [#allocation6], 1 }
 0x33c   :  { %1269 = vsyncpa [#allocation6 + $0x1], 1 }

</bundles_post_ra>
